<compile_context>
chip_gen: v7x
topology: tpu7x:2x2x1
jax: 0.10.0
libtpu: 0.0.40
codegen_flags: <defaults>
</compile_context>

<pallas_src>
import functools

import jax
import jax.numpy as jnp
from jax.experimental import pallas as pl
from jax.experimental.pallas import tpu as pltpu


def _round_up(x, m):
    return ((x + m - 1) // m) * m


def _multihead_kernel(f_ref, w_ref, o_ref, *, num_heads):
    # f_ref: (TN, C)     one tile of features
    # w_ref: (H, C, P)   all head weights (resident across the whole grid)
    # o_ref: (H, TN, P)  per-head logits written directly in head-major layout
    f = f_ref[...]
    for h in range(num_heads):  # H is small & static -> unrolled at trace time
        o_ref[h, :, :] = jnp.dot(
            f, w_ref[h], preferred_element_type=jnp.float32
        ).astype(o_ref.dtype)


def multihead_forward(feats, weights, *, tile_n=2048, compute_dtype=None,
                      out_dtype=None):
    """feats: (N, C); weights: (H, C, P).

    Returns:
      logits        : (H, N, P)  -- feats @ W_h per head (f32 accumulation)
      feats_stacked : (H, N, C)  -- feats replicated per head (pure broadcast,
                                    never touches the kernel)
    """
    N, C = feats.shape
    H, C2, P = weights.shape
    assert C == C2, "weights feature dim must match feats"

    feats_orig = feats
    if out_dtype is None:
        out_dtype = feats.dtype
    if compute_dtype is not None:
        # NOTE: this astype is a full HBM read+write of feats; prefer storing
        # bf16 feats upstream if halved read bandwidth is wanted.
        # (bf16 compute also changes numerics vs the fp32 PyTorch reference.)
        feats = feats.astype(compute_dtype)
        weights = weights.astype(compute_dtype)
    else:
        weights = weights.astype(feats.dtype)

    in_itemsize = jnp.dtype(feats.dtype).itemsize
    out_itemsize = jnp.dtype(out_dtype).itemsize

    # ---- choose the N tile ---------------------------------------------------
    # Sublane granularity: 8 rows for 32-bit, 16 for 16-bit, 32 for 8-bit dtypes.
    sub = 8 if in_itemsize >= 4 else (16 if in_itemsize == 2 else 32)
    n_ceil = _round_up(N, sub)
    tn = max(sub, (int(tile_n) // sub) * sub)
    # Keep >= 2 grid steps once there is enough work so the "parallel" axis can
    # shard across the two TensorCores of a v7x chip.
    if n_ceil >= 2048 and tn >= n_ceil:
        tn = _round_up((n_ceil + 1) // 2, sub)
    tn = min(tn, n_ceil)
    grid = (pl.cdiv(N, tn),)  # partial last block: Pallas masks OOB rows

    # ---- VMEM budget (lane-padded buffer sizes, correct dtypes) --------------
    c_lanes = _round_up(C, 128)
    p_lanes = _round_up(P, 128)
    est_vmem = (
        2 * tn * c_lanes * in_itemsize                      # feats (double-buffered)
        + 2 * H * tn * p_lanes * out_itemsize               # logits (double-buffered)
        + 2 * H * _round_up(C, sub) * p_lanes * in_itemsize # resident weights
    )
    try:
        info = pltpu.get_tpu_info()
        vmem_cap = int(getattr(info, "vmem_capacity_bytes", 64 * 1024 * 1024))
    except Exception:  # no TPU info available -> be conservative
        vmem_cap = 64 * 1024 * 1024
    # 64 MiB parts (v7x): stay <= 48 MiB; 128 MiB parts (v5e/v6e): allow ~100 MiB.
    gen_cap = (48 if vmem_cap <= 64 * 1024 * 1024 else 100) * 1024 * 1024
    vmem_limit = int(min(gen_cap, max(32 * 1024 * 1024,
                                      est_vmem + 8 * 1024 * 1024)))

    cost = pl.CostEstimate(
        flops=2 * N * C * H * P,
        transcendentals=0,
        bytes_accessed=(N * C * in_itemsize
                        + H * C * P * in_itemsize
                        + H * N * P * out_itemsize),
    )

    kernel = functools.partial(_multihead_kernel, num_heads=H)

    logits = pl.pallas_call(
        kernel,
        out_shape=jax.ShapeDtypeStruct((H, N, P), out_dtype),
        grid_spec=pltpu.PrefetchScalarGridSpec(
            num_scalar_prefetch=0,
            grid=grid,
            in_specs=[
                pl.BlockSpec((tn, C), lambda i: (i, 0)),
                # Constant block index -> DMA'd once, resident across the grid.
                pl.BlockSpec((H, C, P), lambda i: (0, 0, 0)),
            ],
            out_specs=pl.BlockSpec((H, tn, P), lambda i: (0, i, 0)),
        ),
        compiler_params=pltpu.CompilerParams(
            dimension_semantics=("parallel",),
            vmem_limit_bytes=vmem_limit,
        ),
        cost_estimate=cost,
    )(feats, weights)

    # Replicated features produced outside the kernel (zero-FLOP broadcast).
    feats_stacked = jnp.broadcast_to(feats_orig[None], (H, N, C))
    return logits, feats_stacked


if __name__ == "__main__":
    # Shapes consistent with the module: N sparse points, input_dim C,
    # num_prototypes P per head, num_heads H.
    N, C, P, H = 64, 32, 16, 3

    key = jax.random.PRNGKey(0)
    k_feats, k_w = jax.random.split(key)
    feats = jax.random.normal(k_feats, (N, C), dtype=jnp.float32)
    # Stand-in for the per-head MinkowskiConvolution kernels
    # (kernel_size=1, bias=False -> one (C, P) matrix per head).
    weights = jax.random.normal(k_w, (H, C, P), dtype=jnp.float32) * 0.02

    logits, feats_stacked = multihead_forward(feats, weights)
    logits = jax.block_until_ready(logits)
    feats_stacked = jax.block_until_ready(feats_stacked)

    # Reference check in plain JAX.
    ref_logits = jnp.einsum("nc,hcp->hnp", feats, weights)
    ref_feats = jnp.broadcast_to(feats[None], (H, N, C))
    assert logits.shape == (H, N, P)
    assert feats_stacked.shape == (H, N, C)
    assert jnp.allclose(logits, ref_logits, atol=1e-4, rtol=1e-4)
    assert jnp.allclose(feats_stacked, ref_feats)

    # Exercise the pad-free partial-last-block path (N % tile != 0).
    logits2, _ = multihead_forward(feats, weights, tile_n=48)
    logits2 = jax.block_until_ready(logits2)
    assert jnp.allclose(logits2, ref_logits, atol=1e-4, rtol=1e-4)

    print("KERNEL_OK")
</pallas_src>

<mosaic_0001>
module attributes {stable_mosaic.version = 11 : i64} {
  func.func @_multihead_kernel(%arg0: i32, %arg1: memref<64x32xf32, #tpu.memory_space<vmem>>, %arg2: memref<3x32x16xf32, #tpu.memory_space<vmem>>, %arg3: memref<3x64x16xf32, #tpu.memory_space<vmem>>) attributes {dimension_semantics = [#tpu.dimension_semantics<parallel>], iteration_bounds = array<i64: 1>, scalar_prefetch = 0 : i64, scratch_operands = 0 : i64, tpu.core_type = #tpu.core_type<tc>, window_params = [{transform_indices = @transform_0, window_bounds = array<i64: 64, 32>}, {pipeline_mode = #tpu.pipeline_mode<synchronous>, transform_indices = @transform_1, window_bounds = array<i64: 3, 32, 16>}, {transform_indices = @transform_2, window_bounds = array<i64: 3, 64, 16>}]} {
    %c0 = arith.constant 0 : index
    %c0_0 = arith.constant 0 : index
    %0 = vector.load %arg1[%c0, %c0_0] : memref<64x32xf32, #tpu.memory_space<vmem>>, vector<64x32xf32>
    %c0_1 = arith.constant 0 : index
    %c0_2 = arith.constant 0 : index
    %c0_3 = arith.constant 0 : index
    %1 = vector.load %arg2[%c0_1, %c0_2, %c0_3] : memref<3x32x16xf32, #tpu.memory_space<vmem>>, vector<1x32x16xf32>
    %2 = vector.shape_cast %1 : vector<1x32x16xf32> to vector<32x16xf32>
    %cst = arith.constant dense<0.000000e+00> : vector<64x16xf32>
    %3 = tpu.matmul %0, %2, %cst {dimension_numbers = #tpu.dot_dimension_numbers<[1], [0], [0], [1], [0, 0, 1, 1], [], []>} : vector<64x32xf32>, vector<32x16xf32>, vector<64x16xf32> -> vector<64x16xf32>
    %c0_4 = arith.constant 0 : index
    %c0_5 = arith.constant 0 : index
    %c0_6 = arith.constant 0 : index
    %4 = vector.load %arg3[%c0_4, %c0_5, %c0_6] : memref<3x64x16xf32, #tpu.memory_space<vmem>>, vector<1x64x16xf32>
    %5 = vector.shape_cast %4 : vector<1x64x16xf32> to vector<64x16xf32>
    %6 = vector.shape_cast %3 : vector<64x16xf32> to vector<1x64x16xf32>
    tpu.vector_store %arg3[%c0_4, %c0_5, %c0_6], %6 {strides = array<i32>} : memref<3x64x16xf32, #tpu.memory_space<vmem>>, vector<1x64x16xf32>,
    %c1 = arith.constant 1 : index
    %c0_7 = arith.constant 0 : index
    %c0_8 = arith.constant 0 : index
    %7 = vector.load %arg2[%c1, %c0_7, %c0_8] : memref<3x32x16xf32, #tpu.memory_space<vmem>>, vector<1x32x16xf32>
    %8 = vector.shape_cast %7 : vector<1x32x16xf32> to vector<32x16xf32>
    %cst_9 = arith.constant dense<0.000000e+00> : vector<64x16xf32>
    %9 = tpu.matmul %0, %8, %cst_9 {dimension_numbers = #tpu.dot_dimension_numbers<[1], [0], [0], [1], [0, 0, 1, 1], [], []>} : vector<64x32xf32>, vector<32x16xf32>, vector<64x16xf32> -> vector<64x16xf32>
    %c1_10 = arith.constant 1 : index
    %c0_11 = arith.constant 0 : index
    %c0_12 = arith.constant 0 : index
    %10 = vector.load %arg3[%c1_10, %c0_11, %c0_12] : memref<3x64x16xf32, #tpu.memory_space<vmem>>, vector<1x64x16xf32>
    %11 = vector.shape_cast %10 : vector<1x64x16xf32> to vector<64x16xf32>
    %12 = vector.shape_cast %9 : vector<64x16xf32> to vector<1x64x16xf32>
    tpu.vector_store %arg3[%c1_10, %c0_11, %c0_12], %12 {strides = array<i32>} : memref<3x64x16xf32, #tpu.memory_space<vmem>>, vector<1x64x16xf32>,
    %c2 = arith.constant 2 : index
    %c0_13 = arith.constant 0 : index
    %c0_14 = arith.constant 0 : index
    %13 = vector.load %arg2[%c2, %c0_13, %c0_14] : memref<3x32x16xf32, #tpu.memory_space<vmem>>, vector<1x32x16xf32>
    %14 = vector.shape_cast %13 : vector<1x32x16xf32> to vector<32x16xf32>
    %cst_15 = arith.constant dense<0.000000e+00> : vector<64x16xf32>
    %15 = tpu.matmul %0, %14, %cst_15 {dimension_numbers = #tpu.dot_dimension_numbers<[1], [0], [0], [1], [0, 0, 1, 1], [], []>} : vector<64x32xf32>, vector<32x16xf32>, vector<64x16xf32> -> vector<64x16xf32>
    %c2_16 = arith.constant 2 : index
    %c0_17 = arith.constant 0 : index
    %c0_18 = arith.constant 0 : index
    %16 = vector.load %arg3[%c2_16, %c0_17, %c0_18] : memref<3x64x16xf32, #tpu.memory_space<vmem>>, vector<1x64x16xf32>
    %17 = vector.shape_cast %16 : vector<1x64x16xf32> to vector<64x16xf32>
    %18 = vector.shape_cast %15 : vector<64x16xf32> to vector<1x64x16xf32>
    tpu.vector_store %arg3[%c2_16, %c0_17, %c0_18], %18 {strides = array<i32>} : memref<3x64x16xf32, #tpu.memory_space<vmem>>, vector<1x64x16xf32>,
    return
  }
  func.func @transform_0(%arg0: i32) -> (i32, i32) {
    %c0_i32 = arith.constant 0 : i32
    %c0_i32_0 = arith.constant 0 : i32
    return %arg0, %c0_i32 : i32, i32
  }
  func.func @transform_1(%arg0: i32) -> (i32, i32, i32) {
    %c0_i32 = arith.constant 0 : i32
    %c0_i32_0 = arith.constant 0 : i32
    %c0_i32_1 = arith.constant 0 : i32
    %c0_i32_2 = arith.constant 0 : i32
    return %c0_i32, %c0_i32_0, %c0_i32_1 : i32, i32, i32
  }
  func.func @transform_2(%arg0: i32) -> (i32, i32, i32) {
    %c0_i32 = arith.constant 0 : i32
    %c0_i32_0 = arith.constant 0 : i32
    %c0_i32_1 = arith.constant 0 : i32
    return %c0_i32, %arg0, %c0_i32_0 : i32, i32, i32
  }
}

</mosaic_0001>

<bundles_post_ra>
// kernel: tpu_custom_call.1
= control target key start
LH: loop header
LB: loop body
LE: loop exit
PB: predicated region body
PF: predicated region fallthrough
CT: control target
= control target key end

     0   :  { %vm23_vm0 = vcmask 261120   ;;  %vm153_vm1 = vcmask 130048   ;;  %s771_s1 = inlined_call_operand.vmem [shape: f32[3,32,16], index: 1, kind: input, shape index: {}]   ;;  %s772_s0 = inlined_call_operand.vmem [shape: f32[64,32], index: 0, kind: input, shape index: {}]   ;;  %s773_s2 = inlined_call_operand.vmem [shape: f32[3,64,16], index: 2, kind: output, shape index: {}]  }
   0x1   :  { %v19_v0 = vld [vmem:[%s771_s1] sm:$0xff]  ;;  %v20_v1 = vld [vmem:[%s771_s1 + $0x8] sm:$0xff]  ;;  %v21_v2 = vld [vmem:[%s771_s1 + $0x10] sm:$0xff] }
   0x2   :  { %v548_v3 = vpack.c.bf16 %v20_v1, %v19_v0  ;;  %v22_v4 = vld [vmem:[%s771_s1 + $0x18] sm:$0xff]  ;;  %v11_v5 = vld [vmem:[%s772_s0] sm:$0xff]  ;;  %v413_v9 = vld [vmem:[%s771_s1 + $0x28] sm:$0xff] }
   0x3   :  { %v15_v6 = vld [vmem:[%s772_s0 + $0x20] sm:$0xff]  ;;  %v552_v7 = vpack.c.bf16 %v22_v4, %v21_v2  ;;  %496 = vmatprep.mubr.msk.f32.mxu0 %vm23_vm0, %v11_v5  ;;  %v433_v11 = vld [vmem:[%s771_s1 + $0x48] sm:$0xff]  ;;  %v414_v14 = vld [vmem:[%s771_s1 + $0x30] sm:$0xff] }
   0x4   :  { %502 = vmatprep.mubr.msk.f32.mxu1 %vm23_vm0, %v15_v6  ;;  %v412_v8 = vld [vmem:[%s771_s1 + $0x20] sm:$0xff]  ;;  %549 = vmatprep.subr.bf16.mxu0 %v548_v3  ;;  %v415_v15 = vld [vmem:[%s771_s1 + $0x38] sm:$0xff]  ;;  %v434_v16 = vld [vmem:[%s771_s1 + $0x50] sm:$0xff] }
   0x5   :  { %572 = vmatprep.subr.bf16.mxu1 %v548_v3  ;;  %v432_v10 = vld [vmem:[%s771_s1 + $0x40] sm:$0xff]  ;;  %551 = vmatpush3.bf16.msra.mxu0 %v548_v3  ;;  %v556_v12 = vpack.c.bf16 %v413_v9, %v412_v8  ;;  %v435_v17 = vld [vmem:[%s771_s1 + $0x58] sm:$0xff]  ;;  %v12_v18 = vld [vmem:[%s772_s0 + $0x8] sm:$0xff]  ;;  %v560_v22 = vpack.c.bf16 %v415_v15, %v414_v14 }
   0x6   :  { %574 = vmatpush3.bf16.msra.mxu1 %v548_v3  ;;  %553 = vmatprep.subr.bf16.mxu0 %v552_v7  ;;  %v564_v13 = vpack.c.bf16 %v433_v11, %v432_v10  ;;  %v16_v19 = vld [vmem:[%s772_s0 + $0x28] sm:$0xff]  ;;  %v13_v20 = vld [vmem:[%s772_s0 + $0x10] sm:$0xff]  ;;  %v568_v23 = vpack.c.bf16 %v435_v17, %v434_v16  ;;  %v14_v24 = vld [vmem:[%s772_s0 + $0x18] sm:$0xff] }
   0x7   :  { %573 = vmatprep.subr.bf16.mxu1 %v552_v7  ;;  %v17_v21 = vld [vmem:[%s772_s0 + $0x30] sm:$0xff]  ;;  %v18_v25 = vld [vmem:[%s772_s0 + $0x38] sm:$0xff] }
   0x9   :  { %555 = vmatpush3.bf16.msra.mxu0 %v552_v7 }
   0xa   :  { %575 = vmatpush3.bf16.msra.mxu1 %v552_v7  ;;  %565 = vmatprep.subr.bf16.mxu0 %v564_v13 }
   0xb   :  { %557 = vmatprep.subr.bf16.mxu1 %v556_v12 }
   0xc   :  { %497 = vmatmul.mubr.msk.f32.vlgmr.msra.gmra.mrb[0].mxu0 %vm23_vm0, %v12_v18 }
   0xd   :  { %503 = vmatmul.mubr.msk.f32.vlgmr.msra.gmra.mrb[0].mxu1 %vm23_vm0, %v16_v19  ;;  %567 = vmatpush3.bf16.msra.mxu0 %v564_v13 }
   0xe   :  { %559 = vmatpush3.bf16.msra.mxu1 %v556_v12  ;;  %499 = vmatprep.mubr.msk.f32.mxu0 %vm23_vm0, %v13_v20 }
   0xf   :  { %505 = vmatprep.mubr.msk.f32.mxu1 %vm23_vm0, %v17_v21  ;;  %561 = vmatprep.subr.bf16.mxu1 %v560_v22 }
  0x10   :  { %569 = vmatprep.subr.bf16.mxu0 %v568_v23  ;;  %500 = vmatmul.mubr.msk.f32.gmra.mrb[2].mxu0 %vm23_vm0, %v14_v24 }
  0x11   :  { %506 = vmatmul.mubr.msk.f32.gmra.mrb[2].mxu1 %vm23_vm0, %v18_v25  ;;  %571 = vmatpush3.bf16.msra.mxu0 %v568_v23 }
  0x12   :  { %563 = vmatpush3.bf16.msra.mxu1 %v560_v22  ;;  %516 = vmatprep.mubr.msk.f32.mxu1 %vm23_vm0, %v11_v5 }
  0x13   :  { %536 = vmatprep.mubr.msk.f32.mxu0 %vm23_vm0, %v11_v5 }
  0x14   :  { %537 = vmatmul.mubr.msk.f32.vlgmr.msra.gmra.mrb[4].mxu0 %vm23_vm0, %v12_v18 }
  0x15   :  { %517 = vmatmul.mubr.msk.f32.vlgmr.msra.gmra.mrb[4].mxu1 %vm23_vm0, %v12_v18  ;;  %539 = vmatprep.mubr.msk.f32.mxu0 %vm23_vm0, %v13_v20 }
  0x16   :  { %519 = vmatprep.mubr.msk.f32.mxu1 %vm23_vm0, %v13_v20 }
  0x18   :  { %540 = vmatmul.mubr.msk.f32.gmra.mrb[6].mxu0 %vm23_vm0, %v14_v24 }
  0x19   :  { %520 = vmatmul.mubr.msk.f32.gmra.mrb[6].mxu1 %vm23_vm0, %v14_v24  ;;  %542 = vmatprep.mubr.msk.f32.mxu0 %vm23_vm0, %v15_v6 }
  0x1a   :  { %522 = vmatprep.mubr.msk.f32.mxu1 %vm23_vm0, %v15_v6 }
  0x1c   :  { %543 = vmatmul.mubr.msk.f32.gmra.mrb[8].mxu0 %vm23_vm0, %v16_v19 }
  0x1d   :  { %523 = vmatmul.mubr.msk.f32.gmra.mrb[8].mxu1 %vm23_vm0, %v16_v19  ;;  %545 = vmatprep.mubr.msk.f32.mxu0 %vm23_vm0, %v17_v21 }
  0x1e   :  { %525 = vmatprep.mubr.msk.f32.mxu1 %vm23_vm0, %v17_v21 }
  0x20   :  { %546 = vmatmul.mubr.msk.f32.gmra.mrb[10].mxu0 %vm23_vm0, %v18_v25 }
  0x21   :  { %526 = vmatmul.mubr.msk.f32.gmra.mrb[10].mxu1 %vm23_vm0, %v18_v25 }
  0xdf   :  { %v498_v26 = vpop.f32.mrb[0].mxu0 }
  0xe0   :  { %v504_v27 = vpop.f32.mrb[0].mxu1  ;;  %155 = vst.msk [vmem:[%s773_s2 + $0x8] sm:$0xff] %vm153_vm1, %v498_v26  ;;  %v114_v28 = vpop.f32.mrb[1].mxu0 }
  0xe1   :  { %159 = vst.msk [vmem:[%s773_s2 + $0x28] sm:$0xff] %vm153_vm1, %v504_v27  ;;  %v134_v29 = vpop.f32.mrb[1].mxu1  ;;  %154 = vst.msk [vmem:[%s773_s2] sm:$0xff] %vm153_vm1, %v114_v28 }
  0xe2   :  { %158 = vst.msk [vmem:[%s773_s2 + $0x20] sm:$0xff] %vm153_vm1, %v134_v29 }
  0xe3   :  { %v501_v30 = vpop.f32.mrb[2].mxu0 }
  0xe4   :  { %v507_v31 = vpop.f32.mrb[2].mxu1  ;;  %157 = vst.msk [vmem:[%s773_s2 + $0x18] sm:$0xff] %vm153_vm1, %v501_v30  ;;  %v124_v32 = vpop.f32.mrb[3].mxu0 }
  0xe5   :  { %161 = vst.msk [vmem:[%s773_s2 + $0x38] sm:$0xff] %vm153_vm1, %v507_v31  ;;  %v144_v33 = vpop.f32.mrb[3].mxu1  ;;  %156 = vst.msk [vmem:[%s773_s2 + $0x10] sm:$0xff] %vm153_vm1, %v124_v32 }
  0xe6   :  { %160 = vst.msk [vmem:[%s773_s2 + $0x30] sm:$0xff] %vm153_vm1, %v144_v33 }
  0xe7   :  { %v538_v35 = vpop.f32.mrb[4].mxu0 }
  0xe8   :  { %v518_v34 = vpop.f32.mrb[4].mxu1  ;;  %445 = vst.msk [vmem:[%s773_s2 + $0x88] sm:$0xff] %vm153_vm1, %v538_v35  ;;  %v352_v37 = vpop.f32.mrb[5].mxu0 }
  0xe9   :  { %425 = vst.msk [vmem:[%s773_s2 + $0x48] sm:$0xff] %vm153_vm1, %v518_v34  ;;  %v233_v36 = vpop.f32.mrb[5].mxu1  ;;  %444 = vst.msk [vmem:[%s773_s2 + $0x80] sm:$0xff] %vm153_vm1, %v352_v37 }
  0xea   :  { %424 = vst.msk [vmem:[%s773_s2 + $0x40] sm:$0xff] %vm153_vm1, %v233_v36 }
  0xeb   :  { %v541_v39 = vpop.f32.mrb[6].mxu0 }
  0xec   :  { %v521_v38 = vpop.f32.mrb[6].mxu1  ;;  %447 = vst.msk [vmem:[%s773_s2 + $0x98] sm:$0xff] %vm153_vm1, %v541_v39  ;;  %v362_v41 = vpop.f32.mrb[7].mxu0 }
  0xed   :  { %427 = vst.msk [vmem:[%s773_s2 + $0x58] sm:$0xff] %vm153_vm1, %v521_v38  ;;  %v243_v40 = vpop.f32.mrb[7].mxu1  ;;  %446 = vst.msk [vmem:[%s773_s2 + $0x90] sm:$0xff] %vm153_vm1, %v362_v41 }
  0xee   :  { %426 = vst.msk [vmem:[%s773_s2 + $0x50] sm:$0xff] %vm153_vm1, %v243_v40 }
  0xef   :  { %v544_v43 = vpop.f32.mrb[8].mxu0 }
  0xf0   :  { %v524_v42 = vpop.f32.mrb[8].mxu1  ;;  %449 = vst.msk [vmem:[%s773_s2 + $0xa8] sm:$0xff] %vm153_vm1, %v544_v43  ;;  %v372_v45 = vpop.f32.mrb[9].mxu0 }
  0xf1   :  { %429 = vst.msk [vmem:[%s773_s2 + $0x68] sm:$0xff] %vm153_vm1, %v524_v42  ;;  %v253_v44 = vpop.f32.mrb[9].mxu1  ;;  %448 = vst.msk [vmem:[%s773_s2 + $0xa0] sm:$0xff] %vm153_vm1, %v372_v45 }
  0xf2   :  { %428 = vst.msk [vmem:[%s773_s2 + $0x60] sm:$0xff] %vm153_vm1, %v253_v44 }
  0xf3   :  { %v547_v47 = vpop.f32.mrb[10].mxu0 }
  0xf4   :  { %v527_v46 = vpop.f32.mrb[10].mxu1  ;;  %451 = vst.msk [vmem:[%s773_s2 + $0xb8] sm:$0xff] %vm153_vm1, %v547_v47  ;;  %v382_v49 = vpop.f32.mrb[11].mxu0 }
  0xf5   :  { %431 = vst.msk [vmem:[%s773_s2 + $0x78] sm:$0xff] %vm153_vm1, %v527_v46  ;;  %v263_v48 = vpop.f32.mrb[11].mxu1  ;;  %450 = vst.msk [vmem:[%s773_s2 + $0xb0] sm:$0xff] %vm153_vm1, %v382_v49 }
  0xf6   :  { %430 = vst.msk [vmem:[%s773_s2 + $0x70] sm:$0xff] %vm153_vm1, %v263_v48 }

</bundles_post_ra>
